<compile_context>
chip_gen: v7x
topology: tpu7x:2x2x1
jax: 0.10.0
libtpu: 0.0.40
codegen_flags: <defaults>
</compile_context>

<pallas_src>
import functools

import jax
import jax.numpy as jnp
from jax.experimental import pallas as pl
from jax.experimental.pallas import tpu as pltpu

LN_EPS = 1e-5  # PyTorch nn.LayerNorm default

# Flipped to False the first time this JAX build rejects pl.Buffered(1) for the
# constant operands; the kernel then falls back to default (double-buffered)
# BlockSpecs with identical semantics.
_SINGLE_BUFFER_CONSTS = [True]


def _cdiv(a, b):
    return -(-a // b)


def _round_up(v, m):
    return ((v + m - 1) // m) * m


def _vmem_capacity_bytes():
    """Physical per-core VMEM; conservative (v7x, 64 MiB) fallback if unknown."""
    try:
        cap = getattr(pltpu.get_tpu_info(), "vmem_capacity_bytes", None)
        if cap:
            return int(cap)
    except Exception:
        pass
    return 64 << 20


def _layernorm_f32(x_ref, gamma_ref, beta_ref, mask_ref, *, d_real, d_pad):
    """LayerNorm over the (possibly lane-padded) last dim. Padded lanes of x are zero."""
    x = x_ref[...].astype(jnp.float32)
    inv_d = jnp.float32(1.0 / d_real)
    mean = jnp.sum(x, axis=-1, keepdims=True) * inv_d        # zero pad lanes -> exact
    centered = x - mean
    if d_real != d_pad:
        centered = centered * mask_ref[...]                   # (1, Dp) f32 resident mask
    var = jnp.sum(centered * centered, axis=-1, keepdims=True) * inv_d
    inv_std = jax.lax.rsqrt(var + LN_EPS)
    return (centered * inv_std) * gamma_ref[...].astype(jnp.float32) \
        + beta_ref[...].astype(jnp.float32)


def prenorm_linear_kernel(x_ref, gamma_ref, beta_ref, mask_ref, w_ref, b_ref,
                          out_ref, *, d_real, d_pad):
    # Resident-W path: W/gamma/beta/mask/b stay in VMEM across all row tiles.
    x_norm = _layernorm_f32(x_ref, gamma_ref, beta_ref, mask_ref,
                            d_real=d_real, d_pad=d_pad)
    y = jnp.dot(x_norm.astype(w_ref.dtype), w_ref[...],
                preferred_element_type=jnp.float32)
    out_ref[...] = (y + b_ref[...].astype(jnp.float32)).astype(out_ref.dtype)


def prenorm_linear_ntiled_kernel(x_ref, gamma_ref, beta_ref, mask_ref, w_ref,
                                 b_ref, out_ref, xnorm_ref, *, d_real, d_pad):
    # Streamed-W path for large D: grid = (row_tiles, col_tiles). K stays whole
    # so no accumulator is needed; LayerNorm is computed once per row tile
    # (j == 0) into a VMEM scratch and reused for every output-column tile.
    @pl.when(pl.program_id(1) == 0)
    def _():
        x_norm = _layernorm_f32(x_ref, gamma_ref, beta_ref, mask_ref,
                                d_real=d_real, d_pad=d_pad)
        xnorm_ref[...] = x_norm.astype(xnorm_ref.dtype)

    y = jnp.dot(xnorm_ref[...], w_ref[...], preferred_element_type=jnp.float32)
    out_ref[...] = (y + b_ref[...].astype(jnp.float32)).astype(out_ref.dtype)


def prenorm_linear(x, gamma, beta, w, b, *, tm_target=512, mxu_dtype=None,
                   force_n_tiling=False, tn=None, vmem_budget_bytes=None):
    """PreNorm forward with fn = Linear(D, D): y = LayerNorm(x) @ w + b.

    x: (..., D). `w` is laid out (D_in, D_out), i.e. torch_linear.weight.T.
    mxu_dtype: optionally feed the matmul in reduced precision (e.g. bf16);
    LayerNorm math and MXU accumulation stay f32.
    """
    orig_shape = x.shape
    D = int(orig_shape[-1])
    x2 = x.reshape(-1, D)
    M = int(x2.shape[0])

    Dp = _round_up(D, 128)                     # lane-dense last dim
    pad_lanes = Dp != D
    mxu_dt = jnp.dtype(mxu_dtype) if mxu_dtype is not None else jnp.dtype(w.dtype)

    x_item = jnp.dtype(x.dtype).itemsize
    w_item = jnp.dtype(mxu_dt).itemsize
    gran = max(8, 32 // x_item)                # sublane granularity (8 f32 / 16 bf16 / 32 i8)

    # ---- one-time parameter prep (cache outside the hot path in a real model) ----
    gamma_p = gamma.reshape(1, D)
    beta_p = beta.reshape(1, D)
    b_p = b.reshape(1, D)
    w_p = w.astype(mxu_dt)
    if pad_lanes:
        pad = Dp - D
        gamma_p = jnp.pad(gamma_p, ((0, 0), (0, pad)))
        beta_p = jnp.pad(beta_p, ((0, 0), (0, pad)))
        b_p = jnp.pad(b_p, ((0, 0), (0, pad)))
        w_p = jnp.pad(w_p, ((0, pad), (0, pad)))
        x2 = jnp.pad(x2, ((0, 0), (0, pad)))   # rows are never padded (ragged tail tile is fine)
    mask = (jnp.arange(Dp, dtype=jnp.int32) < D).astype(jnp.float32).reshape(1, Dp)

    # ---- VMEM budgeting (per generation; conservative v7x fallback) ----
    cap = _vmem_capacity_bytes()
    budget = vmem_budget_bytes if vmem_budget_bytes is not None \
        else min((cap * 3) // 4, 96 << 20)                 # v7x ~48 MiB, v5e/v6e ~96 MiB
    vmem_cap = max(min(cap - (8 << 20), 100 << 20), 16 << 20)

    param_bytes = 10 * Dp * 4                              # gamma/beta/mask/b (+ slack)
    w_resident = Dp * Dp * w_item                          # single-buffered resident W
    # double-buffered x/out row tiles + ~4 f32 in-kernel temporaries per element
    per_row = Dp * (4 * x_item + 16)

    use_n_tiling = force_n_tiling or \
        (w_resident + param_bytes + gran * per_row > budget)

    cost = pl.CostEstimate(
        flops=2 * M * D * D + 8 * M * D,
        transcendentals=M,                                  # one rsqrt per row
        bytes_accessed=2 * M * D * x_item + D * D * w_item + 4 * D * 4,
    )

    tn_ = Dp
    scratch = []
    if not use_n_tiling:
        tm_cap = max(gran, (budget - w_resident - param_bytes) // per_row)
        tm = int(min(tm_target, tm_cap))
        tm = max(gran, (tm // gran) * gran)
        if tm >= 256:
            tm = (tm // 128) * 128                          # MXU-friendly large row tiles
        if M > gran:                                        # >=2 row tiles: megacore + pipeline
            tm = min(tm, _round_up(_cdiv(M, 2), gran))
        tm = max(gran, min(tm, _round_up(M, gran)))
        grid = (_cdiv(M, tm),)
        # Limit sized for the worst case (double-buffered W fallback).
        vmem_needed = 2 * w_resident + param_bytes + tm * per_row
        kernel = functools.partial(prenorm_linear_kernel, d_real=D, d_pad=Dp)
    else:
        tn_ = int(tn) if tn else 512
        tn_ = max(128, min((tn_ // 128) * 128, Dp))

        def _fit(tn_c):
            fixed = 2 * Dp * tn_c * w_item + param_bytes    # streamed (double-buffered) W tile
            per_row_n = Dp * (2 * x_item + w_item + 16) + 2 * tn_c * x_item
            return (budget - fixed) // per_row_n, per_row_n, fixed

        tm_cap, per_row_n, fixed = _fit(tn_)
        while tm_cap < gran and tn_ > 128:
            tn_ = max(128, tn_ // 2)
            tm_cap, per_row_n, fixed = _fit(tn_)
        tm = int(min(tm_target, max(tm_cap, gran)))
        tm = max(gran, (tm // gran) * gran)
        if M > gran:
            tm = min(tm, _round_up(_cdiv(M, 2), gran))
        tm = max(gran, min(tm, _round_up(M, gran)))
        grid = (_cdiv(M, tm), _cdiv(Dp, tn_))
        vmem_needed = fixed + tm * per_row_n
        kernel = functools.partial(prenorm_linear_ntiled_kernel, d_real=D, d_pad=Dp)
        scratch = [pltpu.VMEM((tm, Dp), mxu_dt)]

    vmem_limit = None
    if vmem_needed > (12 << 20):                            # v5e default scoped limit is 16 MiB
        vmem_limit = int(min(max(vmem_needed * 5 // 4 + (2 << 20), 16 << 20), vmem_cap))

    def _const_spec(shape, index_map, single_buffer):
        if single_buffer:
            return pl.BlockSpec(shape, index_map, pipeline_mode=pl.Buffered(1))
        return pl.BlockSpec(shape, index_map)

    def _call(single_buffer):
        if not use_n_tiling:
            in_specs = [
                pl.BlockSpec((tm, Dp), lambda i: (i, 0)),                 # x: row-tiled
                _const_spec((1, Dp), lambda i: (0, 0), single_buffer),    # gamma: resident
                _const_spec((1, Dp), lambda i: (0, 0), single_buffer),    # beta:  resident
                _const_spec((1, Dp), lambda i: (0, 0), single_buffer),    # lane mask
                _const_spec((Dp, Dp), lambda i: (0, 0), single_buffer),   # W:     resident
                _const_spec((1, Dp), lambda i: (0, 0), single_buffer),    # b:     resident
            ]
            out_specs = pl.BlockSpec((tm, Dp), lambda i: (i, 0))
            dims = ("parallel",)
        else:
            in_specs = [
                pl.BlockSpec((tm, Dp), lambda i, j: (i, 0)),              # x resident across j
                _const_spec((1, Dp), lambda i, j: (0, 0), single_buffer),
                _const_spec((1, Dp), lambda i, j: (0, 0), single_buffer),
                _const_spec((1, Dp), lambda i, j: (0, 0), single_buffer),
                pl.BlockSpec((Dp, tn_), lambda i, j: (0, j)),             # W column tile (streamed)
                pl.BlockSpec((1, tn_), lambda i, j: (0, j)),              # b column tile
            ]
            out_specs = pl.BlockSpec((tm, tn_), lambda i, j: (i, j))
            dims = ("parallel", "arbitrary")
        return pl.pallas_call(
            kernel,
            out_shape=jax.ShapeDtypeStruct((M, Dp), x.dtype),
            grid=grid,
            in_specs=in_specs,
            out_specs=out_specs,
            scratch_shapes=scratch,
            compiler_params=pltpu.CompilerParams(
                dimension_semantics=dims,
                vmem_limit_bytes=vmem_limit,
            ),
            cost_estimate=cost,
        )(x2, gamma_p, beta_p, mask, w_p, b_p)

    if _SINGLE_BUFFER_CONSTS[0]:
        try:
            out = _call(True)
        except Exception:
            _SINGLE_BUFFER_CONSTS[0] = False
            out = _call(False)
    else:
        out = _call(False)

    if pad_lanes:
        out = out[:, :D]
    return out.reshape(orig_shape)


def reference(x, gamma, beta, w, b):
    xf = x.astype(jnp.float32)
    mean = jnp.mean(xf, axis=-1, keepdims=True)
    var = jnp.mean((xf - mean) ** 2, axis=-1, keepdims=True)
    xn = (xf - mean) / jnp.sqrt(var + LN_EPS) * gamma + beta
    return (xn @ w + b).astype(x.dtype)


if __name__ == "__main__":
    key = jax.random.PRNGKey(0)
    k1, k2, k3, k4, k5 = jax.random.split(key, 5)

    # --- Test 1: canonical small PreNorm(dim=32, fn=Linear(32, 32)), resident-W path ---
    batch, seq, dim = 2, 8, 32
    x = jax.random.normal(k1, (batch, seq, dim), dtype=jnp.float32)
    gamma = 1.0 + 0.1 * jax.random.normal(k2, (dim,), dtype=jnp.float32)
    beta = 0.1 * jax.random.normal(k3, (dim,), dtype=jnp.float32)
    w = jax.random.normal(k4, (dim, dim), dtype=jnp.float32) * 0.02
    b = jax.random.normal(k5, (dim,), dtype=jnp.float32) * 0.02

    out = jax.block_until_ready(prenorm_linear(x, gamma, beta, w, b))
    ref = reference(x, gamma, beta, w, b)
    assert out.shape == (batch, seq, dim)
    assert jnp.allclose(out, ref, atol=2e-5, rtol=2e-5), "resident-W path mismatch"

    # --- Test 2: exercise the streamed-W (N-tiled) fallback at a small shape ---
    batch2, seq2, dim2 = 2, 16, 256
    x2 = jax.random.normal(k1, (batch2, seq2, dim2), dtype=jnp.float32)
    gamma2 = 1.0 + 0.1 * jax.random.normal(k2, (dim2,), dtype=jnp.float32)
    beta2 = 0.1 * jax.random.normal(k3, (dim2,), dtype=jnp.float32)
    w2 = jax.random.normal(k4, (dim2, dim2), dtype=jnp.float32) * 0.02
    b2 = jax.random.normal(k5, (dim2,), dtype=jnp.float32) * 0.02

    out2 = jax.block_until_ready(
        prenorm_linear(x2, gamma2, beta2, w2, b2,
                       force_n_tiling=True, tn=128, tm_target=16))
    ref2 = reference(x2, gamma2, beta2, w2, b2)
    assert out2.shape == (batch2, seq2, dim2)
    assert jnp.allclose(out2, ref2, atol=2e-3, rtol=2e-3), "N-tiled path mismatch"

    # TODO(synk): PreNorm wraps an arbitrary `fn`; only fn = Linear(dim, dim) is fused here.
    print("KERNEL_OK")
</pallas_src>

<mosaic_0001>
module attributes {stable_mosaic.version = 11 : i64} {
  func.func @prenorm_linear_kernel(%arg0: i32, %arg1: memref<8x128xf32, #tpu.memory_space<vmem>>, %arg2: memref<1x128xf32, #tpu.memory_space<vmem>>, %arg3: memref<1x128xf32, #tpu.memory_space<vmem>>, %arg4: memref<1x128xf32, #tpu.memory_space<vmem>>, %arg5: memref<128x128xf32, #tpu.memory_space<vmem>>, %arg6: memref<1x128xf32, #tpu.memory_space<vmem>>, %arg7: memref<8x128xf32, #tpu.memory_space<vmem>>) attributes {dimension_semantics = [#tpu.dimension_semantics<parallel>], iteration_bounds = array<i64: 2>, scalar_prefetch = 0 : i64, scratch_operands = 0 : i64, tpu.core_type = #tpu.core_type<tc>, window_params = [{transform_indices = @transform_0, window_bounds = array<i64: 8, 128>}, {pipeline_mode = #tpu.pipeline_mode<synchronous>, transform_indices = @transform_1, window_bounds = array<i64: 1, 128>}, {pipeline_mode = #tpu.pipeline_mode<synchronous>, transform_indices = @transform_2, window_bounds = array<i64: 1, 128>}, {pipeline_mode = #tpu.pipeline_mode<synchronous>, transform_indices = @transform_3, window_bounds = array<i64: 1, 128>}, {pipeline_mode = #tpu.pipeline_mode<synchronous>, transform_indices = @transform_4, window_bounds = array<i64: 128, 128>}, {pipeline_mode = #tpu.pipeline_mode<synchronous>, transform_indices = @transform_5, window_bounds = array<i64: 1, 128>}, {transform_indices = @transform_6, window_bounds = array<i64: 8, 128>}]} {
    %c0 = arith.constant 0 : index
    %c0_0 = arith.constant 0 : index
    %0 = vector.load %arg1[%c0, %c0_0] : memref<8x128xf32, #tpu.memory_space<vmem>>, vector<8x128xf32>
    %cst = arith.constant dense<0.000000e+00> : vector<8xf32>
    %1 = vector.multi_reduction <add>, %0, %cst [1] : vector<8x128xf32> to vector<8xf32>
    %2 = vector.shape_cast %1 : vector<8xf32> to vector<8x1xf32>
    %cst_1 = arith.constant 3.125000e-02 : f32
    %3 = vector.broadcast %cst_1 : f32 to vector<8x1xf32>
    %4 = arith.mulf %2, %3 : vector<8x1xf32>
    %5 = vector.broadcast %4 : vector<8x1xf32> to vector<8x128xf32>
    %6 = arith.subf %0, %5 : vector<8x128xf32>
    %c0_2 = arith.constant 0 : index
    %c0_3 = arith.constant 0 : index
    %7 = vector.load %arg4[%c0_2, %c0_3] : memref<1x128xf32, #tpu.memory_space<vmem>>, vector<1x128xf32>
    %8 = vector.broadcast %7 : vector<1x128xf32> to vector<8x128xf32>
    %9 = arith.mulf %6, %8 : vector<8x128xf32>
    %10 = arith.mulf %9, %9 : vector<8x128xf32>
    %cst_4 = arith.constant dense<0.000000e+00> : vector<8xf32>
    %11 = vector.multi_reduction <add>, %10, %cst_4 [1] : vector<8x128xf32> to vector<8xf32>
    %12 = vector.shape_cast %11 : vector<8xf32> to vector<8x1xf32>
    %cst_5 = arith.constant 3.125000e-02 : f32
    %13 = vector.broadcast %cst_5 : f32 to vector<8x1xf32>
    %14 = arith.mulf %12, %13 : vector<8x1xf32>
    %cst_6 = arith.constant 9.99999974E-6 : f32
    %15 = vector.broadcast %cst_6 : f32 to vector<8x1xf32>
    %16 = arith.addf %14, %15 : vector<8x1xf32>
    %17 = math.rsqrt %16 : vector<8x1xf32>
    %18 = vector.broadcast %17 : vector<8x1xf32> to vector<8x128xf32>
    %19 = arith.mulf %9, %18 : vector<8x128xf32>
    %c0_7 = arith.constant 0 : index
    %c0_8 = arith.constant 0 : index
    %20 = vector.load %arg2[%c0_7, %c0_8] : memref<1x128xf32, #tpu.memory_space<vmem>>, vector<1x128xf32>
    %21 = vector.broadcast %20 : vector<1x128xf32> to vector<8x128xf32>
    %22 = arith.mulf %19, %21 : vector<8x128xf32>
    %c0_9 = arith.constant 0 : index
    %c0_10 = arith.constant 0 : index
    %23 = vector.load %arg3[%c0_9, %c0_10] : memref<1x128xf32, #tpu.memory_space<vmem>>, vector<1x128xf32>
    %24 = vector.broadcast %23 : vector<1x128xf32> to vector<8x128xf32>
    %25 = arith.addf %22, %24 : vector<8x128xf32>
    %c0_11 = arith.constant 0 : index
    %c0_12 = arith.constant 0 : index
    %26 = vector.load %arg5[%c0_11, %c0_12] : memref<128x128xf32, #tpu.memory_space<vmem>>, vector<128x128xf32>
    %cst_13 = arith.constant dense<0.000000e+00> : vector<8x128xf32>
    %27 = tpu.matmul %25, %26, %cst_13 {dimension_numbers = #tpu.dot_dimension_numbers<[1], [0], [0], [1], [0, 0, 1, 1], [], []>} : vector<8x128xf32>, vector<128x128xf32>, vector<8x128xf32> -> vector<8x128xf32>
    %c0_14 = arith.constant 0 : index
    %c0_15 = arith.constant 0 : index
    %28 = vector.load %arg6[%c0_14, %c0_15] : memref<1x128xf32, #tpu.memory_space<vmem>>, vector<1x128xf32>
    %29 = vector.broadcast %28 : vector<1x128xf32> to vector<8x128xf32>
    %30 = arith.addf %27, %29 : vector<8x128xf32>
    %c0_16 = arith.constant 0 : index
    %c0_17 = arith.constant 0 : index
    %31 = vector.load %arg7[%c0_16, %c0_17] : memref<8x128xf32, #tpu.memory_space<vmem>>, vector<8x128xf32>
    tpu.vector_store %arg7[%c0_16, %c0_17], %30 {strides = array<i32>} : memref<8x128xf32, #tpu.memory_space<vmem>>, vector<8x128xf32>,
    return
  }
  func.func @transform_0(%arg0: i32) -> (i32, i32) {
    %c0_i32 = arith.constant 0 : i32
    %c0_i32_0 = arith.constant 0 : i32
    return %arg0, %c0_i32 : i32, i32
  }
  func.func @transform_1(%arg0: i32) -> (i32, i32) {
    %c0_i32 = arith.constant 0 : i32
    %c0_i32_0 = arith.constant 0 : i32
    %c0_i32_1 = arith.constant 0 : i32
    return %c0_i32, %c0_i32_0 : i32, i32
  }
  func.func @transform_2(%arg0: i32) -> (i32, i32) {
    %c0_i32 = arith.constant 0 : i32
    %c0_i32_0 = arith.constant 0 : i32
    %c0_i32_1 = arith.constant 0 : i32
    return %c0_i32, %c0_i32_0 : i32, i32
  }
  func.func @transform_3(%arg0: i32) -> (i32, i32) {
    %c0_i32 = arith.constant 0 : i32
    %c0_i32_0 = arith.constant 0 : i32
    %c0_i32_1 = arith.constant 0 : i32
    return %c0_i32, %c0_i32_0 : i32, i32
  }
  func.func @transform_4(%arg0: i32) -> (i32, i32) {
    %c0_i32 = arith.constant 0 : i32
    %c0_i32_0 = arith.constant 0 : i32
    %c0_i32_1 = arith.constant 0 : i32
    return %c0_i32, %c0_i32_0 : i32, i32
  }
  func.func @transform_5(%arg0: i32) -> (i32, i32) {
    %c0_i32 = arith.constant 0 : i32
    %c0_i32_0 = arith.constant 0 : i32
    %c0_i32_1 = arith.constant 0 : i32
    return %c0_i32, %c0_i32_0 : i32, i32
  }
  func.func @transform_6(%arg0: i32) -> (i32, i32) {
    %c0_i32 = arith.constant 0 : i32
    %c0_i32_0 = arith.constant 0 : i32
    return %arg0, %c0_i32 : i32, i32
  }
}

module attributes {stable_mosaic.version = 11 : i64} {
  func.func @prenorm_linear_kernel(%arg0: i32, %arg1: memref<8x128xf32, #tpu.memory_space<vmem>>, %arg2: memref<1x128xf32, #tpu.memory_space<vmem>>, %arg3: memref<1x128xf32, #tpu.memory_space<vmem>>, %arg4: memref<1x128xf32, #tpu.memory_space<vmem>>, %arg5: memref<128x128xf32, #tpu.memory_space<vmem>>, %arg6: memref<1x128xf32, #tpu.memory_space<vmem>>, %arg7: memref<8x128xf32, #tpu.memory_space<vmem>>) attributes {dimension_semantics = [#tpu.dimension_semantics<parallel>], iteration_bounds = array<i64: 2>, scalar_prefetch = 0 : i64, scratch_operands = 0 : i64, tpu.core_type = #tpu.core_type<tc>, window_params = [{transform_indices = @transform_0, window_bounds = array<i64: 8, 128>}, {pipeline_mode = #tpu.pipeline_mode<synchronous>, transform_indices = @transform_1, window_bounds = array<i64: 1, 128>}, {pipeline_mode = #tpu.pipeline_mode<synchronous>, transform_indices = @transform_2, window_bounds = array<i64: 1, 128>}, {pipeline_mode = #tpu.pipeline_mode<synchronous>, transform_indices = @transform_3, window_bounds = array<i64: 1, 128>}, {pipeline_mode = #tpu.pipeline_mode<synchronous>, transform_indices = @transform_4, window_bounds = array<i64: 128, 128>}, {pipeline_mode = #tpu.pipeline_mode<synchronous>, transform_indices = @transform_5, window_bounds = array<i64: 1, 128>}, {transform_indices = @transform_6, window_bounds = array<i64: 8, 128>}]} {
    %c0 = arith.constant 0 : index
    %c0_0 = arith.constant 0 : index
    %0 = vector.load %arg1[%c0, %c0_0] : memref<8x128xf32, #tpu.memory_space<vmem>>, vector<8x128xf32>
    %cst = arith.constant dense<0.000000e+00> : vector<8xf32>
    %1 = vector.multi_reduction <add>, %0, %cst [1] : vector<8x128xf32> to vector<8xf32>
    %2 = vector.shape_cast %1 : vector<8xf32> to vector<8x1xf32>
    %cst_1 = arith.constant 3.125000e-02 : f32
    %3 = vector.broadcast %cst_1 : f32 to vector<8x1xf32>
    %4 = arith.mulf %2, %3 : vector<8x1xf32>
    %5 = vector.broadcast %4 : vector<8x1xf32> to vector<8x128xf32>
    %6 = arith.subf %0, %5 : vector<8x128xf32>
    %c0_2 = arith.constant 0 : index
    %c0_3 = arith.constant 0 : index
    %7 = vector.load %arg4[%c0_2, %c0_3] : memref<1x128xf32, #tpu.memory_space<vmem>>, vector<1x128xf32>
    %8 = vector.broadcast %7 : vector<1x128xf32> to vector<8x128xf32>
    %9 = arith.mulf %6, %8 : vector<8x128xf32>
    %10 = arith.mulf %9, %9 : vector<8x128xf32>
    %cst_4 = arith.constant dense<0.000000e+00> : vector<8xf32>
    %11 = vector.multi_reduction <add>, %10, %cst_4 [1] : vector<8x128xf32> to vector<8xf32>
    %12 = vector.shape_cast %11 : vector<8xf32> to vector<8x1xf32>
    %cst_5 = arith.constant 3.125000e-02 : f32
    %13 = vector.broadcast %cst_5 : f32 to vector<8x1xf32>
    %14 = arith.mulf %12, %13 : vector<8x1xf32>
    %cst_6 = arith.constant 9.99999974E-6 : f32
    %15 = vector.broadcast %cst_6 : f32 to vector<8x1xf32>
    %16 = arith.addf %14, %15 : vector<8x1xf32>
    %17 = math.rsqrt %16 : vector<8x1xf32>
    %18 = vector.broadcast %17 : vector<8x1xf32> to vector<8x128xf32>
    %19 = arith.mulf %9, %18 : vector<8x128xf32>
    %c0_7 = arith.constant 0 : index
    %c0_8 = arith.constant 0 : index
    %20 = vector.load %arg2[%c0_7, %c0_8] : memref<1x128xf32, #tpu.memory_space<vmem>>, vector<1x128xf32>
    %21 = vector.broadcast %20 : vector<1x128xf32> to vector<8x128xf32>
    %22 = arith.mulf %19, %21 : vector<8x128xf32>
    %c0_9 = arith.constant 0 : index
    %c0_10 = arith.constant 0 : index
    %23 = vector.load %arg3[%c0_9, %c0_10] : memref<1x128xf32, #tpu.memory_space<vmem>>, vector<1x128xf32>
    %24 = vector.broadcast %23 : vector<1x128xf32> to vector<8x128xf32>
    %25 = arith.addf %22, %24 : vector<8x128xf32>
    %c0_11 = arith.constant 0 : index
    %c0_12 = arith.constant 0 : index
    %26 = vector.load %arg5[%c0_11, %c0_12] : memref<128x128xf32, #tpu.memory_space<vmem>>, vector<128x128xf32>
    %cst_13 = arith.constant dense<0.000000e+00> : vector<8x128xf32>
    %27 = tpu.matmul %25, %26, %cst_13 {dimension_numbers = #tpu.dot_dimension_numbers<[1], [0], [0], [1], [0, 0, 1, 1], [], []>} : vector<8x128xf32>, vector<128x128xf32>, vector<8x128xf32> -> vector<8x128xf32>
    %c0_14 = arith.constant 0 : index
    %c0_15 = arith.constant 0 : index
    %28 = vector.load %arg6[%c0_14, %c0_15] : memref<1x128xf32, #tpu.memory_space<vmem>>, vector<1x128xf32>
    %29 = vector.broadcast %28 : vector<1x128xf32> to vector<8x128xf32>
    %30 = arith.addf %27, %29 : vector<8x128xf32>
    %c0_16 = arith.constant 0 : index
    %c0_17 = arith.constant 0 : index
    %31 = vector.load %arg7[%c0_16, %c0_17] : memref<8x128xf32, #tpu.memory_space<vmem>>, vector<8x128xf32>
    tpu.vector_store %arg7[%c0_16, %c0_17], %30 {strides = array<i32>} : memref<8x128xf32, #tpu.memory_space<vmem>>, vector<8x128xf32>,
    return
  }
  func.func @transform_0(%arg0: i32) -> (i32, i32) {
    %c0_i32 = arith.constant 0 : i32
    %c0_i32_0 = arith.constant 0 : i32
    return %arg0, %c0_i32 : i32, i32
  }
  func.func @transform_1(%arg0: i32) -> (i32, i32) {
    %c0_i32 = arith.constant 0 : i32
    %c0_i32_0 = arith.constant 0 : i32
    %c0_i32_1 = arith.constant 0 : i32
    return %c0_i32, %c0_i32_0 : i32, i32
  }
  func.func @transform_2(%arg0: i32) -> (i32, i32) {
    %c0_i32 = arith.constant 0 : i32
    %c0_i32_0 = arith.constant 0 : i32
    %c0_i32_1 = arith.constant 0 : i32
    return %c0_i32, %c0_i32_0 : i32, i32
  }
  func.func @transform_3(%arg0: i32) -> (i32, i32) {
    %c0_i32 = arith.constant 0 : i32
    %c0_i32_0 = arith.constant 0 : i32
    %c0_i32_1 = arith.constant 0 : i32
    return %c0_i32, %c0_i32_0 : i32, i32
  }
  func.func @transform_4(%arg0: i32) -> (i32, i32) {
    %c0_i32 = arith.constant 0 : i32
    %c0_i32_0 = arith.constant 0 : i32
    %c0_i32_1 = arith.constant 0 : i32
    return %c0_i32, %c0_i32_0 : i32, i32
  }
  func.func @transform_5(%arg0: i32) -> (i32, i32) {
    %c0_i32 = arith.constant 0 : i32
    %c0_i32_0 = arith.constant 0 : i32
    %c0_i32_1 = arith.constant 0 : i32
    return %c0_i32, %c0_i32_0 : i32, i32
  }
  func.func @transform_6(%arg0: i32) -> (i32, i32) {
    %c0_i32 = arith.constant 0 : i32
    %c0_i32_0 = arith.constant 0 : i32
    return %arg0, %c0_i32 : i32, i32
  }
}

</mosaic_0001>

<bundles_post_ra>
// kernel: tpu_custom_call.1
= control target key start
LH: loop header
LB: loop body
LE: loop exit
PB: predicated region body
PF: predicated region fallthrough
CT: control target
= control target key end

     0   :  { %11 = vsyncpa [#allocation3], 0  ;;  %s1049_s0 = inlined_call_operand.hbm [shape: f32[16,128], index: 0, kind: input, shape index: {}]   ;;  %s1050_s1 = inlined_call_operand.vmem [shape: f32[1,128], index: 1, kind: input, shape index: {}]   ;;  %s1051_s2 = inlined_call_operand.vmem [shape: f32[1,128], index: 2, kind: input, shape index: {}]   ;;  %s1052_s3 = inlined_call_operand.vmem [shape: f32[1,128], index: 3, kind: input, shape index: {}]   ;;  %s1053_s4 = inlined_call_operand.hbm [shape: f32[128,128], index: 4, kind: input, shape index: {}]   ;;  %s1054_s5 = inlined_call_operand.vmem [shape: f32[1,128], index: 5, kind: input, shape index: {}]   ;;  %s1055_s6 = inlined_call_operand.hbm [shape: f32[16,128], index: 6, kind: output, shape index: {}]  }
   0x1   :  { %13 = vsyncpa [#allocation3 + $0x1], 0 }
   0x2   :  { %14 = vsyncpa [#allocation6], 0 }
   0x3   :  { %15 = vsyncpa [#allocation4], 0 }
   0x4   :  { %17 = vsyncpa [#allocation4 + $0x1], 0  ;;  %s837_s21 = smov 0   ;;  %s839_s22 = smov 0  }
   0x5   :  { %s841_s23 = smov 0   ;;  %s843_s24 = smov 0  }
   0x6 LB: > { %s858_s25 = sadd.s32 4294967295, %s792_s24   ;;  %s506_s26 = sadd.s32 4294967294, %s792_s24   ;;  %s792_s24 = sphi %s843_s24, %s1075_s24   ;;  %s788_s23 = sphi %s841_s23, %s1074_s23   ;;  %s784_s22 = sphi %s839_s22, %s1073_s22   ;;  %s780_s21 = sphi %s837_s21, %s1072_s21  }
   0x7   : > { %p43_p0 = scmp.ne.s32.totalorder %s784_s22, %s780_s21  ;;  %p1056_p1 = scmp.eq.s32.totalorder %s858_s25, 0 }
   0x8   : > { %p178_p3 = scmp.eq.s32.totalorder %s506_s26, 1  ;;  %p507_p5 = scmp.ge.s32.totalorder %s792_s24, 1 }
   0x9   : > { %p867_p4 = por %p1056_p1, %p43_p0  ;;  %p185_p7 = scmp.lt.s32.totalorder %s792_s24, 3 }
   0xa   : > { %p872_p6 = por %p178_p3, %p43_p0  ;;  %s794_s30 = smov [#allocation5]  }
   0xb   : > { %s1059_s27 = scalar_select %p867_p4, 1, 0 }
   0xc   : > { %s1060_s28 = scalar_select %p872_p6, 1, 0 }
   0xd   : > { %p877_p8 = pnand %p507_p5, %p185_p7  ;;  %s206_s7 = sshll.u32 %s794_s30, 4  ;;  %s881_s7 = int_to_ptr.vmem [resolvable:$true] %s206_s7 }
   0xe   : > { %s893_s9 = sadd.s32 1, %s792_s24   ;;  %s30_s10 = sadd.s32 1, %s788_s23 }
   0xf   : > { %s1061_s29 = scalar_select %p877_p8, 1, 0 }
  0x10   : > { %p608_p9 = pneg %p877_p8  ;;  %s27_s11 = ssub.s32 %s792_s24, %s893_s9 }
  0x11   : > { %s664_s14 = scalar_lea.hbm %s1053_s4, 2048 }
  0x12   : > { %p888_p11 = pnand %p608_p9, %p1056_p1  ;;  %p665_p12 = scmp.ne.s32.totalorder %s1053_s4, %s664_s14 }
  0x13   : > { %p671_p5 = scmp.lt.u32.totalorder %s664_s14, %s1053_s4 }
  0x14   : > { %p666_p13 = pneg %p888_p11 }
  0x16   : > { %p667_p0 = pnand %p666_p13, %p665_p12 }
  0x18   : > { %p668_p3 = pneg %p667_p0 }
  0x1a   : > { %p673_p7 = pnand %p671_p5, %p668_p3 }
  0x1c   : > { %676 = shalt.err (!%p673_p7)
}
  0x1d   : > { %s677_s19 = scalar_lea.vmem %s881_s7, 2048  ;;  %p685_p2 = scmp.lt.s32.totalorder %s881_s7, %s881_s7 }
  0x1e   : > { %p678_p9 = scmp.ne.s32.totalorder %s881_s7, %s677_s19  ;;  %p686_p6 = scmp.lt.s32.totalorder %s677_s19, %s677_s19 }
  0x20   : > { %p680_p10 = pnand %p678_p9, %p666_p13  ;;  %p687_p4 = por %p686_p6, %p685_p2 }
  0x22   : > { %p681_p1 = pneg %p680_p10 }
  0x24   : > { %p688_p8 = pnand %p687_p4, %p681_p1 }
  0x26   : > { %691 = shalt.err (!%p688_p8)
}
  0x27   : > { %s795_s20 = smov 128   ;;  %s796_s26 = smov 8  }
  0x28   : > { %611 = dma.hbm_to_vmem [thread:$0]  (!%p888_p11), %s1053_s4, 2048, %s881_s7, [#allocation6], %s795_s20, %s795_s20, %s796_s26  }
  0x29   : > { %p28_p2 = scmp.eq.s32.totalorder %s27_s11, 0  ;;  %p37_p1 = scmp.ne.s32.totalorder %s788_s23, %s784_s22 }
  0x2a   : > { %p38_p4 = scmp.eq.s32.totalorder %s792_s24, 0  ;;  %p621_p6 = scmp.lt.s32.totalorder %s792_s24, 2 }
  0x2b   : > { %s924_s13 = scalar_select %p28_p2, %s788_s23, %s30_s10  }
  0x2c   : > { %p39_p8 = por %p38_p4, %p37_p1  ;;  %p1063_p10 = scmp.eq.s32.totalorder %s858_s25, 1 }
  0x2d   : > { %s223_s15 = sand.u32 1, %s788_s23   ;;  %s511_s16 = sshll.u32 %s792_s24, 7 }
  0x2e   : > { %p928_p12 = por %p1063_p10, %p37_p1  ;;  %s510_s17 = sshll.u32 %s223_s15, 3 }
  0x2f   : > { %s937_s19 = scalar_lea.hbm %s1049_s0, %s511_s16  ;;  %s227_s7 = scalar_lea.vmem [#allocation2], %s510_s17 }
  0x30   : > { %s234_s10 = sshll.u32 %s227_s7, 4  ;;  %p939_p11 = pnand %p621_p6, %p39_p8  ;;  %s943_s10 = int_to_ptr.vmem [resolvable:$true] %s234_s10 }
  0x31   : > { %s224_s20 = scalar_lea.sflag [#allocation3], %s223_s15  ;;  %s692_s26 = scalar_lea.hbm %s937_s19, 128 }
  0x32   : > { %p693_p13 = scmp.ne.s32.totalorder %s937_s19, %s692_s26  ;;  %p694_p0 = pneg %p939_p11 }
  0x33   : > { %s697_s16 = scalar_lea.hbm %s1049_s0, 256  ;;  %p698_p7 = scmp.lt.u32.totalorder %s937_s19, %s1049_s0 }
  0x34   : > { %p695_p3 = pnand %p694_p0, %p693_p13  ;;  %p699_p9 = scmp.lt.u32.totalorder %s697_s16, %s692_s26 }
  0x35   : > { %p701_p1 = scmp.lt.u32.totalorder %s692_s26, %s937_s19 }
  0x36   : > { %p696_p5 = pneg %p695_p3  ;;  %p700_p2 = por %p699_p9, %p698_p7 }
  0x38   : > { %p702_p4 = por %p701_p1, %p700_p2 }
  0x3a   : > { %p703_p6 = pnand %p702_p4, %p696_p5 }
  0x3c   : > { %706 = shalt.err (!%p703_p6)
}
  0x3d   : > { %s707_s15 = scalar_lea.vmem %s943_s10, 128  ;;  %s797_s18 = smov [#allocation2]  }
  0x3e   : > { %p708_p8 = scmp.ne.s32.totalorder %s943_s10, %s707_s15  ;;  %s712_s7 = sshll.u32 %s797_s18, 4  ;;  %s713_s7 = int_to_ptr.vmem [resolvable:$false] %s712_s7 }
  0x3f   : > { %s714_s30 = scalar_lea.vmem %s713_s7, 256  ;;  %p715_p3 = scmp.lt.s32.totalorder %s943_s10, %s713_s7 }
  0x40   : > { %p710_p10 = pnand %p708_p8, %p694_p0  ;;  %p716_p7 = scmp.lt.s32.totalorder %s714_s30, %s707_s15 }
  0x42   : > { %p711_p13 = pneg %p710_p10  ;;  %p717_p9 = por %p716_p7, %p715_p3 }
  0x44   : > { %p718_p2 = pnand %p717_p9, %p711_p13 }
  0x46   : > { %721 = shalt.err (!%p718_p2)
}
  0x47   : > { %615 = dma.hbm_to_vmem [thread:$0]  (!%p939_p11), %s937_s19, 128, %s943_s10, %s224_s20  }
  0x48   : > { %p1066_p5 = scmp.ne.s32.totalorder %s1061_s29, 0 }
  0x49   : > { %s973_s26 = sand.u32 (!%p1066_p5), 1, %s784_s22   ;;  %p1067_p0 = scmp.ne.s32.totalorder (!%p1066_p5), %s1059_s27, 0 }
  0x4a   : > { %243 = sbr.rel (%p1066_p5) target bundleno = 627 (0x273), region = 44  ;;  %s513_s12 = sshll.u32 (!%p1066_p5), %s973_s26, 3 }
  0x4b   : > { %s246_s16 = scalar_lea.sflag (!%p1066_p5), [#allocation3], %s973_s26  ;;  %s249_s17 = scalar_lea.vmem (!%p1066_p5), [#allocation2], %s513_s12 }
  0x51   : > { %767 = dma.done.wait (%p1067_p0), %s246_s16, 128  }
  0x52   : > { %769 = vsyncadd (%p1067_p0), %s246_s16, 4294967168  ;;  %p1068_p11 = scmp.eq.s32.totalorder %s858_s25, 0 }
  0x54   : > { %771 = dma.done.wait (%p1068_p11), [#allocation6], 2048   ;;  %p1069_p1 = pmov %p1068_p11 }
  0x55   : > { %v282_v0 = vld [vmem:[%s249_s17] sm:$0xff]  ;;  %v318_v1 = vld [vmem:[#allocation5] sm:$0xff]  ;;  %v319_v2 = vld [vmem:[#allocation5 + $0x8] sm:$0xff]  ;;  %v798_v4 = vmov 0.0|0.0   ;;  %vm799_vm0 = vmmov 0   ;;  %v800_v25 = vmov 0.0  }
  0x56   : > { %773 = vsyncadd (%p1069_p1), [#allocation6], 4294965248  ;;  %283 = vadd.xlane.f32.xlu0 %v282_v0  ;;  %v320_v3 = vld [vmem:[#allocation5 + $0x10] sm:$0xff]  ;;  %576 = vmatprep.subr.bf16.mxu0 %v798_v4  ;;  %v577_v5 = vpack.c.bf16 %v319_v2, %v318_v1  ;;  %v321_v6 = vld [vmem:[#allocation5 + $0x18] sm:$0xff]  ;;  %s521_s18 = sshll.u32 %s858_s25, 7  ;;  %s281_s7 = scalar_lea.vmem [#allocation7], %s513_s12 }
  0x57   : > { %v580_v7 = vpack.c.bf16 %v321_v6, %v320_v3  ;;  %v322_v8 = vld [vmem:[#allocation5 + $0x20] sm:$0xff]  ;;  %v323_v9 = vld [vmem:[#allocation5 + $0x28] sm:$0xff]  ;;  %v516_v13 = vld [vmem:[%s1052_s3] ss:$0 sm:$0xff]  ;;  %573 = vmatprep.mubr.msk.f32.mxu0 %vm799_vm0, %v800_v25  ;;  %s426_s30 = sshll.u32 %s281_s7, 4  ;;  %s1005_s27 = scalar_lea.hbm %s1055_s6, %s521_s18  ;;  %s1007_s30 = int_to_ptr.vmem [resolvable:$true] %s426_s30 }
  0x58   : > { %578 = vmatpush3.bf16.msra.mxu0 %v577_v5  ;;  %v583_v10 = vpack.c.bf16 %v323_v9, %v322_v8  ;;  %v324_v17 = vld [vmem:[#allocation5 + $0x30] sm:$0xff]  ;;  %v325_v18 = vld [vmem:[#allocation5 + $0x38] sm:$0xff]  ;;  %v326_v20 = vld [vmem:[#allocation5 + $0x40] sm:$0xff]  ;;  %s413_s29 = scalar_lea.sflag [#allocation4], %s973_s26  ;;  %s722_s19 = scalar_lea.vmem %s1007_s30, 128 }
  0x59   : > { %579 = vmatprep.subr.bf16.mxu0 %v798_v4  ;;  %v586_v19 = vpack.c.bf16 %v325_v18, %v324_v17  ;;  %v327_v21 = vld [vmem:[#allocation5 + $0x48] sm:$0xff]  ;;  %v328_v23 = vld [vmem:[#allocation5 + $0x50] sm:$0xff]  ;;  %v329_v24 = vld [vmem:[#allocation5 + $0x58] sm:$0xff]  ;;  %p723_p4 = scmp.ne.s32.totalorder %s1007_s30, %s722_s19  ;;  %s801_s25 = smov [#allocation7]  }
  0x5a   : > { %v589_v22 = vpack.c.bf16 %v327_v21, %v326_v20  ;;  %v592_v26 = vpack.c.bf16 %v329_v24, %v328_v23  ;;  %v330_v27 = vld [vmem:[#allocation5 + $0x60] sm:$0xff]  ;;  %v331_v28 = vld [vmem:[#allocation5 + $0x68] sm:$0xff]  ;;  %v332_v30 = vld [vmem:[#allocation5 + $0x70] sm:$0xff]  ;;  %s726_s12 = sshll.u32 %s801_s25, 4  ;;  %s727_s12 = int_to_ptr.vmem [resolvable:$false] %s726_s12 }
  0x5b   : > { %v595_v29 = vpack.c.bf16 %v331_v28, %v330_v27  ;;  %v333_v31 = vld [vmem:[#allocation5 + $0x78] sm:$0xff]  ;;  %v517_v37 = vld [vmem:[%s1050_s1] ss:$0 sm:$0xff]  ;;  %p724_p6 = pnand %p723_p4, %p928_p12  ;;  %s728_s10 = scalar_lea.vmem %s727_s12, 256 }
  0x5c   : > { %581 = vmatpush3.bf16.msra.mxu0 %v580_v7  ;;  %v598_v32 = vpack.c.bf16 %v333_v31, %v332_v30  ;;  %v518_v39 = vld [vmem:[%s1051_s2] ss:$0 sm:$0xff]  ;;  %p729_p10 = scmp.lt.s32.totalorder %s1007_s30, %s727_s12  ;;  %p730_p13 = scmp.lt.s32.totalorder %s728_s10, %s722_s19 }
  0x5d   : > { %582 = vmatprep.subr.bf16.mxu0 %v798_v4  ;;  %v519_v42 = vld [vmem:[%s1054_s5] ss:$0 sm:$0xff]  ;;  %p725_p8 = pneg %p724_p6 }
  0x5e   : > { %p731_p3 = por %p730_p13, %p729_p10 }
  0x60   : > { %584 = vmatpush3.bf16.msra.mxu0 %v583_v10  ;;  %p732_p7 = pnand %p731_p3, %p725_p8 }
  0x61   : > { %585 = vmatprep.subr.bf16.mxu0 %v798_v4 }
  0x64   : > { %587 = vmatpush3.bf16.msra.mxu0 %v586_v19 }
  0x65   : > { %588 = vmatprep.subr.bf16.mxu0 %v798_v4 }
  0x68   : > { %590 = vmatpush3.bf16.msra.mxu0 %v589_v22 }
  0x69   : > { %591 = vmatprep.subr.bf16.mxu0 %v798_v4 }
  0x6c   : > { %593 = vmatpush3.bf16.msra.mxu0 %v592_v26 }
  0x6d   : > { %594 = vmatprep.subr.bf16.mxu0 %v798_v4 }
  0x70   : > { %596 = vmatpush3.bf16.msra.mxu0 %v595_v29 }
  0x71   : > { %597 = vmatprep.subr.bf16.mxu0 %v798_v4 }
  0x74   : > { %599 = vmatpush3.bf16.msra.mxu0 %v598_v32 }
  0xe3   : > { %v284_v11 = vpop.xlane.xlu0 %283 }
  0xe4   : > { %v285_v12 = vmul.f32 0.03125, %v284_v11 }
  0xe6   : > { %v286_v14 = vsub.f32 %v282_v0, %v285_v12 }
  0xe8   : > { %v294_v15 = vmul.f32 %v516_v13, %v286_v14 }
  0xea   : > { %v295_v16 = vmul.f32 %v294_v15, %v294_v15 }
  0xec   : > { %296 = vadd.xlane.f32.xlu0 %v295_v16 }
 0x179   : > { %v297_v33 = vpop.xlane.xlu0 %296 }
 0x17a   : > { %v298_v34 = vmul.f32 0.03125, %v297_v33 }
 0x17c   : > { %v299_v35 = vadd.f32 1e-05, %v298_v34 }
 0x17e   : > { %662 = vrsqrt.f32 %v299_v35 }
 0x188   : > { %v663_v36 = vpop.eup %662 }
 0x189   : > { %v301_v38 = vmul.f32 %v663_v36, %v294_v15 }
 0x18b   : > { %v309_v40 = vmul.f32 %v517_v37, %v301_v38 }
 0x18d   : > { %v317_v41 = vadd.f32 %v518_v39, %v309_v40 }
 0x18f   : > { %574 = vmatmul.mubr.f32.vlgmr.msra.gmra.mrb[0].mxu0 %v317_v41 }
 0x262   : > { %v407_v43 = vpop.f32.mrb[0].mxu0 }
 0x263   : > { %v408_v44 = vadd.f32 %v519_v42, %v407_v43  ;;  %v575_v45 = vpop.f32.mrb[1].mxu0 }
 0x265   : > { %411 = vst [vmem:[%s281_s7] sm:$0xff] %v408_v44 }
 0x266   : > { %735 = shalt.err (!%p732_p7)
}
 0x267   : > { %s736_s26 = scalar_lea.hbm %s1005_s27, 128  ;;  %s740_s8 = scalar_lea.hbm %s1055_s6, 256 }
 0x268   : > { %p737_p9 = scmp.ne.s32.totalorder %s1005_s27, %s736_s26  ;;  %p741_p0 = scmp.lt.u32.totalorder %s1005_s27, %s1055_s6 }
 0x269   : > { %p742_p11 = scmp.lt.u32.totalorder %s740_s8, %s736_s26  ;;  %p744_p4 = scmp.lt.u32.totalorder %s736_s26, %s1005_s27 }
 0x26a   : > { %p738_p2 = pnand %p737_p9, %p928_p12 }
 0x26b   : > { %p743_p1 = por %p742_p11, %p741_p0 }
 0x26c   : > { %p739_p5 = pneg %p738_p2 }
 0x26d   : > { %p745_p6 = por %p744_p4, %p743_p1 }
 0x26f   : > { %p746_p8 = pnand %p745_p6, %p739_p5 }
 0x271   : > { %749 = shalt.err (!%p746_p8)
}
 0x272   : > { %606 = dma.vmem_to_hbm [thread:$0]  (%p928_p12), %s1007_s30, 128, %s1005_s27, %s413_s29  }
 0x273 PF: > { %s438_s7 = sand.u32 1, %s780_s21   ;;  %p1070_p10 = scmp.ne.s32.totalorder %s1060_s28, 0 }
 0x274   : > { %p1071_p13 = scmp.ge.s32.totalorder %s792_s24, 2  ;;  %s439_s16 = scalar_lea.sflag [#allocation4], %s438_s7 }
 0x276   : > { %p617_p3 = pnand %p1071_p13, %p1070_p10 }
 0x278   : > { %775 = dma.done.wait (!%p617_p3), %s439_s16, 128  }
 0x279   : > { %777 = vsyncadd (!%p617_p3), %s439_s16, 4294967168  ;;  %p20_p7 = scmp.ge.s32.totalorder %s893_s9, 4   ;;  %s1072_s21 = smov %s784_s22 }
 0x27a   : > { %s1073_s22 = smov %s788_s23  ;;  %s1074_s23 = smov %s924_s13 }
 0x27b   : > { %s1075_s24 = smov %s893_s9  ;;  %22 = sbr.rel (!%p20_p7) target bundleno = 6 (0x6), region = 93 }
 0x282   :  { %444 = vsyncpa [#allocation3], 1 }
 0x283   :  { %446 = vsyncpa [#allocation3 + $0x1], 1 }
 0x284   :  { %447 = vsyncpa [#allocation6], 1 }
 0x285   :  { %448 = vsyncpa [#allocation4], 1 }
 0x286   :  { %450 = vsyncpa [#allocation4 + $0x1], 1 }

// kernel: tpu_custom_call.1
= control target key start
LH: loop header
LB: loop body
LE: loop exit
PB: predicated region body
PF: predicated region fallthrough
CT: control target
= control target key end

     0   :  { %11 = vsyncpa [#allocation3], 0  ;;  %s1049_s0 = inlined_call_operand.hbm [shape: f32[16,128], index: 0, kind: input, shape index: {}]   ;;  %s1050_s1 = inlined_call_operand.vmem [shape: f32[1,128], index: 1, kind: input, shape index: {}]   ;;  %s1051_s2 = inlined_call_operand.vmem [shape: f32[1,128], index: 2, kind: input, shape index: {}]   ;;  %s1052_s3 = inlined_call_operand.vmem [shape: f32[1,128], index: 3, kind: input, shape index: {}]   ;;  %s1053_s4 = inlined_call_operand.hbm [shape: f32[128,128], index: 4, kind: input, shape index: {}]   ;;  %s1054_s5 = inlined_call_operand.vmem [shape: f32[1,128], index: 5, kind: input, shape index: {}]   ;;  %s1055_s6 = inlined_call_operand.hbm [shape: f32[16,128], index: 6, kind: output, shape index: {}]  }
   0x1   :  { %13 = vsyncpa [#allocation3 + $0x1], 0 }
   0x2   :  { %14 = vsyncpa [#allocation6], 0 }
   0x3   :  { %15 = vsyncpa [#allocation4], 0 }
   0x4   :  { %17 = vsyncpa [#allocation4 + $0x1], 0  ;;  %s837_s21 = smov 0   ;;  %s839_s22 = smov 0  }
   0x5   :  { %s841_s23 = smov 0   ;;  %s843_s24 = smov 0  }
   0x6 LB: > { %s858_s25 = sadd.s32 4294967295, %s792_s24   ;;  %s506_s26 = sadd.s32 4294967294, %s792_s24   ;;  %s792_s24 = sphi %s843_s24, %s1075_s24   ;;  %s788_s23 = sphi %s841_s23, %s1074_s23   ;;  %s784_s22 = sphi %s839_s22, %s1073_s22   ;;  %s780_s21 = sphi %s837_s21, %s1072_s21  }
   0x7   : > { %p43_p0 = scmp.ne.s32.totalorder %s784_s22, %s780_s21  ;;  %p1056_p1 = scmp.eq.s32.totalorder %s858_s25, 0 }
   0x8   : > { %p178_p3 = scmp.eq.s32.totalorder %s506_s26, 1  ;;  %p507_p5 = scmp.ge.s32.totalorder %s792_s24, 1 }
   0x9   : > { %p867_p4 = por %p1056_p1, %p43_p0  ;;  %p185_p7 = scmp.lt.s32.totalorder %s792_s24, 3 }
   0xa   : > { %p872_p6 = por %p178_p3, %p43_p0  ;;  %s794_s30 = smov [#allocation5]  }
   0xb   : > { %s1059_s27 = scalar_select %p867_p4, 1, 0 }
   0xc   : > { %s1060_s28 = scalar_select %p872_p6, 1, 0 }
   0xd   : > { %p877_p8 = pnand %p507_p5, %p185_p7  ;;  %s206_s7 = sshll.u32 %s794_s30, 4  ;;  %s881_s7 = int_to_ptr.vmem [resolvable:$true] %s206_s7 }
   0xe   : > { %s893_s9 = sadd.s32 1, %s792_s24   ;;  %s30_s10 = sadd.s32 1, %s788_s23 }
   0xf   : > { %s1061_s29 = scalar_select %p877_p8, 1, 0 }
  0x10   : > { %p608_p9 = pneg %p877_p8  ;;  %s27_s11 = ssub.s32 %s792_s24, %s893_s9 }
  0x11   : > { %s664_s14 = scalar_lea.hbm %s1053_s4, 2048 }
  0x12   : > { %p888_p11 = pnand %p608_p9, %p1056_p1  ;;  %p665_p12 = scmp.ne.s32.totalorder %s1053_s4, %s664_s14 }
  0x13   : > { %p671_p5 = scmp.lt.u32.totalorder %s664_s14, %s1053_s4 }
  0x14   : > { %p666_p13 = pneg %p888_p11 }
  0x16   : > { %p667_p0 = pnand %p666_p13, %p665_p12 }
  0x18   : > { %p668_p3 = pneg %p667_p0 }
  0x1a   : > { %p673_p7 = pnand %p671_p5, %p668_p3 }
  0x1c   : > { %676 = shalt.err (!%p673_p7)
}
  0x1d   : > { %s677_s19 = scalar_lea.vmem %s881_s7, 2048  ;;  %p685_p2 = scmp.lt.s32.totalorder %s881_s7, %s881_s7 }
  0x1e   : > { %p678_p9 = scmp.ne.s32.totalorder %s881_s7, %s677_s19  ;;  %p686_p6 = scmp.lt.s32.totalorder %s677_s19, %s677_s19 }
  0x20   : > { %p680_p10 = pnand %p678_p9, %p666_p13  ;;  %p687_p4 = por %p686_p6, %p685_p2 }
  0x22   : > { %p681_p1 = pneg %p680_p10 }
  0x24   : > { %p688_p8 = pnand %p687_p4, %p681_p1 }
  0x26   : > { %691 = shalt.err (!%p688_p8)
}
  0x27   : > { %s795_s20 = smov 128   ;;  %s796_s26 = smov 8  }
  0x28   : > { %611 = dma.hbm_to_vmem [thread:$0]  (!%p888_p11), %s1053_s4, 2048, %s881_s7, [#allocation6], %s795_s20, %s795_s20, %s796_s26  }
  0x29   : > { %p28_p2 = scmp.eq.s32.totalorder %s27_s11, 0  ;;  %p37_p1 = scmp.ne.s32.totalorder %s788_s23, %s784_s22 }
  0x2a   : > { %p38_p4 = scmp.eq.s32.totalorder %s792_s24, 0  ;;  %p621_p6 = scmp.lt.s32.totalorder %s792_s24, 2 }
  0x2b   : > { %s924_s13 = scalar_select %p28_p2, %s788_s23, %s30_s10  }
  0x2c   : > { %p39_p8 = por %p38_p4, %p37_p1  ;;  %p1063_p10 = scmp.eq.s32.totalorder %s858_s25, 1 }
  0x2d   : > { %s223_s15 = sand.u32 1, %s788_s23   ;;  %s511_s16 = sshll.u32 %s792_s24, 7 }
  0x2e   : > { %p928_p12 = por %p1063_p10, %p37_p1  ;;  %s510_s17 = sshll.u32 %s223_s15, 3 }
  0x2f   : > { %s937_s19 = scalar_lea.hbm %s1049_s0, %s511_s16  ;;  %s227_s7 = scalar_lea.vmem [#allocation2], %s510_s17 }
  0x30   : > { %s234_s10 = sshll.u32 %s227_s7, 4  ;;  %p939_p11 = pnand %p621_p6, %p39_p8  ;;  %s943_s10 = int_to_ptr.vmem [resolvable:$true] %s234_s10 }
  0x31   : > { %s224_s20 = scalar_lea.sflag [#allocation3], %s223_s15  ;;  %s692_s26 = scalar_lea.hbm %s937_s19, 128 }
  0x32   : > { %p693_p13 = scmp.ne.s32.totalorder %s937_s19, %s692_s26  ;;  %p694_p0 = pneg %p939_p11 }
  0x33   : > { %s697_s16 = scalar_lea.hbm %s1049_s0, 256  ;;  %p698_p7 = scmp.lt.u32.totalorder %s937_s19, %s1049_s0 }
  0x34   : > { %p695_p3 = pnand %p694_p0, %p693_p13  ;;  %p699_p9 = scmp.lt.u32.totalorder %s697_s16, %s692_s26 }
  0x35   : > { %p701_p1 = scmp.lt.u32.totalorder %s692_s26, %s937_s19 }
  0x36   : > { %p696_p5 = pneg %p695_p3  ;;  %p700_p2 = por %p699_p9, %p698_p7 }
  0x38   : > { %p702_p4 = por %p701_p1, %p700_p2 }
  0x3a   : > { %p703_p6 = pnand %p702_p4, %p696_p5 }
  0x3c   : > { %706 = shalt.err (!%p703_p6)
}
  0x3d   : > { %s707_s15 = scalar_lea.vmem %s943_s10, 128  ;;  %s797_s18 = smov [#allocation2]  }
  0x3e   : > { %p708_p8 = scmp.ne.s32.totalorder %s943_s10, %s707_s15  ;;  %s712_s7 = sshll.u32 %s797_s18, 4  ;;  %s713_s7 = int_to_ptr.vmem [resolvable:$false] %s712_s7 }
  0x3f   : > { %s714_s30 = scalar_lea.vmem %s713_s7, 256  ;;  %p715_p3 = scmp.lt.s32.totalorder %s943_s10, %s713_s7 }
  0x40   : > { %p710_p10 = pnand %p708_p8, %p694_p0  ;;  %p716_p7 = scmp.lt.s32.totalorder %s714_s30, %s707_s15 }
  0x42   : > { %p711_p13 = pneg %p710_p10  ;;  %p717_p9 = por %p716_p7, %p715_p3 }
  0x44   : > { %p718_p2 = pnand %p717_p9, %p711_p13 }
  0x46   : > { %721 = shalt.err (!%p718_p2)
}
  0x47   : > { %615 = dma.hbm_to_vmem [thread:$0]  (!%p939_p11), %s937_s19, 128, %s943_s10, %s224_s20  }
  0x48   : > { %p1066_p5 = scmp.ne.s32.totalorder %s1061_s29, 0 }
  0x49   : > { %s973_s26 = sand.u32 (!%p1066_p5), 1, %s784_s22   ;;  %p1067_p0 = scmp.ne.s32.totalorder (!%p1066_p5), %s1059_s27, 0 }
  0x4a   : > { %243 = sbr.rel (%p1066_p5) target bundleno = 627 (0x273), region = 44  ;;  %s513_s12 = sshll.u32 (!%p1066_p5), %s973_s26, 3 }
  0x4b   : > { %s246_s16 = scalar_lea.sflag (!%p1066_p5), [#allocation3], %s973_s26  ;;  %s249_s17 = scalar_lea.vmem (!%p1066_p5), [#allocation2], %s513_s12 }
  0x51   : > { %767 = dma.done.wait (%p1067_p0), %s246_s16, 128  }
  0x52   : > { %769 = vsyncadd (%p1067_p0), %s246_s16, 4294967168  ;;  %p1068_p11 = scmp.eq.s32.totalorder %s858_s25, 0 }
  0x54   : > { %771 = dma.done.wait (%p1068_p11), [#allocation6], 2048   ;;  %p1069_p1 = pmov %p1068_p11 }
  0x55   : > { %v282_v0 = vld [vmem:[%s249_s17] sm:$0xff]  ;;  %v318_v1 = vld [vmem:[#allocation5] sm:$0xff]  ;;  %v319_v2 = vld [vmem:[#allocation5 + $0x8] sm:$0xff]  ;;  %v798_v4 = vmov 0.0|0.0   ;;  %vm799_vm0 = vmmov 0   ;;  %v800_v25 = vmov 0.0  }
  0x56   : > { %773 = vsyncadd (%p1069_p1), [#allocation6], 4294965248  ;;  %283 = vadd.xlane.f32.xlu0 %v282_v0  ;;  %v320_v3 = vld [vmem:[#allocation5 + $0x10] sm:$0xff]  ;;  %576 = vmatprep.subr.bf16.mxu0 %v798_v4  ;;  %v577_v5 = vpack.c.bf16 %v319_v2, %v318_v1  ;;  %v321_v6 = vld [vmem:[#allocation5 + $0x18] sm:$0xff]  ;;  %s521_s18 = sshll.u32 %s858_s25, 7  ;;  %s281_s7 = scalar_lea.vmem [#allocation7], %s513_s12 }
  0x57   : > { %v580_v7 = vpack.c.bf16 %v321_v6, %v320_v3  ;;  %v322_v8 = vld [vmem:[#allocation5 + $0x20] sm:$0xff]  ;;  %v323_v9 = vld [vmem:[#allocation5 + $0x28] sm:$0xff]  ;;  %v516_v13 = vld [vmem:[%s1052_s3] ss:$0 sm:$0xff]  ;;  %573 = vmatprep.mubr.msk.f32.mxu0 %vm799_vm0, %v800_v25  ;;  %s426_s30 = sshll.u32 %s281_s7, 4  ;;  %s1005_s27 = scalar_lea.hbm %s1055_s6, %s521_s18  ;;  %s1007_s30 = int_to_ptr.vmem [resolvable:$true] %s426_s30 }
  0x58   : > { %578 = vmatpush3.bf16.msra.mxu0 %v577_v5  ;;  %v583_v10 = vpack.c.bf16 %v323_v9, %v322_v8  ;;  %v324_v17 = vld [vmem:[#allocation5 + $0x30] sm:$0xff]  ;;  %v325_v18 = vld [vmem:[#allocation5 + $0x38] sm:$0xff]  ;;  %v326_v20 = vld [vmem:[#allocation5 + $0x40] sm:$0xff]  ;;  %s413_s29 = scalar_lea.sflag [#allocation4], %s973_s26  ;;  %s722_s19 = scalar_lea.vmem %s1007_s30, 128 }
  0x59   : > { %579 = vmatprep.subr.bf16.mxu0 %v798_v4  ;;  %v586_v19 = vpack.c.bf16 %v325_v18, %v324_v17  ;;  %v327_v21 = vld [vmem:[#allocation5 + $0x48] sm:$0xff]  ;;  %v328_v23 = vld [vmem:[#allocation5 + $0x50] sm:$0xff]  ;;  %v329_v24 = vld [vmem:[#allocation5 + $0x58] sm:$0xff]  ;;  %p723_p4 = scmp.ne.s32.totalorder %s1007_s30, %s722_s19  ;;  %s801_s25 = smov [#allocation7]  }
  0x5a   : > { %v589_v22 = vpack.c.bf16 %v327_v21, %v326_v20  ;;  %v592_v26 = vpack.c.bf16 %v329_v24, %v328_v23  ;;  %v330_v27 = vld [vmem:[#allocation5 + $0x60] sm:$0xff]  ;;  %v331_v28 = vld [vmem:[#allocation5 + $0x68] sm:$0xff]  ;;  %v332_v30 = vld [vmem:[#allocation5 + $0x70] sm:$0xff]  ;;  %s726_s12 = sshll.u32 %s801_s25, 4  ;;  %s727_s12 = int_to_ptr.vmem [resolvable:$false] %s726_s12 }
  0x5b   : > { %v595_v29 = vpack.c.bf16 %v331_v28, %v330_v27  ;;  %v333_v31 = vld [vmem:[#allocation5 + $0x78] sm:$0xff]  ;;  %v517_v37 = vld [vmem:[%s1050_s1] ss:$0 sm:$0xff]  ;;  %p724_p6 = pnand %p723_p4, %p928_p12  ;;  %s728_s10 = scalar_lea.vmem %s727_s12, 256 }
  0x5c   : > { %581 = vmatpush3.bf16.msra.mxu0 %v580_v7  ;;  %v598_v32 = vpack.c.bf16 %v333_v31, %v332_v30  ;;  %v518_v39 = vld [vmem:[%s1051_s2] ss:$0 sm:$0xff]  ;;  %p729_p10 = scmp.lt.s32.totalorder %s1007_s30, %s727_s12  ;;  %p730_p13 = scmp.lt.s32.totalorder %s728_s10, %s722_s19 }
  0x5d   : > { %582 = vmatprep.subr.bf16.mxu0 %v798_v4  ;;  %v519_v42 = vld [vmem:[%s1054_s5] ss:$0 sm:$0xff]  ;;  %p725_p8 = pneg %p724_p6 }
  0x5e   : > { %p731_p3 = por %p730_p13, %p729_p10 }
  0x60   : > { %584 = vmatpush3.bf16.msra.mxu0 %v583_v10  ;;  %p732_p7 = pnand %p731_p3, %p725_p8 }
  0x61   : > { %585 = vmatprep.subr.bf16.mxu0 %v798_v4 }
  0x64   : > { %587 = vmatpush3.bf16.msra.mxu0 %v586_v19 }
  0x65   : > { %588 = vmatprep.subr.bf16.mxu0 %v798_v4 }
  0x68   : > { %590 = vmatpush3.bf16.msra.mxu0 %v589_v22 }
  0x69   : > { %591 = vmatprep.subr.bf16.mxu0 %v798_v4 }
  0x6c   : > { %593 = vmatpush3.bf16.msra.mxu0 %v592_v26 }
  0x6d   : > { %594 = vmatprep.subr.bf16.mxu0 %v798_v4 }
  0x70   : > { %596 = vmatpush3.bf16.msra.mxu0 %v595_v29 }
  0x71   : > { %597 = vmatprep.subr.bf16.mxu0 %v798_v4 }
  0x74   : > { %599 = vmatpush3.bf16.msra.mxu0 %v598_v32 }
  0xe3   : > { %v284_v11 = vpop.xlane.xlu0 %283 }
  0xe4   : > { %v285_v12 = vmul.f32 0.03125, %v284_v11 }
  0xe6   : > { %v286_v14 = vsub.f32 %v282_v0, %v285_v12 }
  0xe8   : > { %v294_v15 = vmul.f32 %v516_v13, %v286_v14 }
  0xea   : > { %v295_v16 = vmul.f32 %v294_v15, %v294_v15 }
  0xec   : > { %296 = vadd.xlane.f32.xlu0 %v295_v16 }
 0x179   : > { %v297_v33 = vpop.xlane.xlu0 %296 }
 0x17a   : > { %v298_v34 = vmul.f32 0.03125, %v297_v33 }
 0x17c   : > { %v299_v35 = vadd.f32 1e-05, %v298_v34 }
 0x17e   : > { %662 = vrsqrt.f32 %v299_v35 }
 0x188   : > { %v663_v36 = vpop.eup %662 }
 0x189   : > { %v301_v38 = vmul.f32 %v663_v36, %v294_v15 }
 0x18b   : > { %v309_v40 = vmul.f32 %v517_v37, %v301_v38 }
 0x18d   : > { %v317_v41 = vadd.f32 %v518_v39, %v309_v40 }
 0x18f   : > { %574 = vmatmul.mubr.f32.vlgmr.msra.gmra.mrb[0].mxu0 %v317_v41 }
 0x262   : > { %v407_v43 = vpop.f32.mrb[0].mxu0 }
 0x263   : > { %v408_v44 = vadd.f32 %v519_v42, %v407_v43  ;;  %v575_v45 = vpop.f32.mrb[1].mxu0 }
 0x265   : > { %411 = vst [vmem:[%s281_s7] sm:$0xff] %v408_v44 }
 0x266   : > { %735 = shalt.err (!%p732_p7)
}
 0x267   : > { %s736_s26 = scalar_lea.hbm %s1005_s27, 128  ;;  %s740_s8 = scalar_lea.hbm %s1055_s6, 256 }
 0x268   : > { %p737_p9 = scmp.ne.s32.totalorder %s1005_s27, %s736_s26  ;;  %p741_p0 = scmp.lt.u32.totalorder %s1005_s27, %s1055_s6 }
 0x269   : > { %p742_p11 = scmp.lt.u32.totalorder %s740_s8, %s736_s26  ;;  %p744_p4 = scmp.lt.u32.totalorder %s736_s26, %s1005_s27 }
 0x26a   : > { %p738_p2 = pnand %p737_p9, %p928_p12 }
 0x26b   : > { %p743_p1 = por %p742_p11, %p741_p0 }
 0x26c   : > { %p739_p5 = pneg %p738_p2 }
 0x26d   : > { %p745_p6 = por %p744_p4, %p743_p1 }
 0x26f   : > { %p746_p8 = pnand %p745_p6, %p739_p5 }
 0x271   : > { %749 = shalt.err (!%p746_p8)
}
 0x272   : > { %606 = dma.vmem_to_hbm [thread:$0]  (%p928_p12), %s1007_s30, 128, %s1005_s27, %s413_s29  }
 0x273 PF: > { %s438_s7 = sand.u32 1, %s780_s21   ;;  %p1070_p10 = scmp.ne.s32.totalorder %s1060_s28, 0 }
 0x274   : > { %p1071_p13 = scmp.ge.s32.totalorder %s792_s24, 2  ;;  %s439_s16 = scalar_lea.sflag [#allocation4], %s438_s7 }
 0x276   : > { %p617_p3 = pnand %p1071_p13, %p1070_p10 }
 0x278   : > { %775 = dma.done.wait (!%p617_p3), %s439_s16, 128  }
 0x279   : > { %777 = vsyncadd (!%p617_p3), %s439_s16, 4294967168  ;;  %p20_p7 = scmp.ge.s32.totalorder %s893_s9, 4   ;;  %s1072_s21 = smov %s784_s22 }
 0x27a   : > { %s1073_s22 = smov %s788_s23  ;;  %s1074_s23 = smov %s924_s13 }
 0x27b   : > { %s1075_s24 = smov %s893_s9  ;;  %22 = sbr.rel (!%p20_p7) target bundleno = 6 (0x6), region = 93 }
 0x282   :  { %444 = vsyncpa [#allocation3], 1 }
 0x283   :  { %446 = vsyncpa [#allocation3 + $0x1], 1 }
 0x284   :  { %447 = vsyncpa [#allocation6], 1 }
 0x285   :  { %448 = vsyncpa [#allocation4], 1 }
 0x286   :  { %450 = vsyncpa [#allocation4 + $0x1], 1 }

</bundles_post_ra>
